<compile_context>
chip_gen: v6e
topology: v6e:2x2x1
jax: 0.10.0
libtpu: 0.0.40
codegen_flags: <defaults>
</compile_context>

<pallas_src>
import functools

import jax
import jax.numpy as jnp
from jax import lax
from jax.experimental import pallas as pl
from jax.experimental.pallas import tpu as pltpu

_LN_EPS = 1e-5


def _round_up(n: int, m: int) -> int:
    return ((n + m - 1) // m) * m


def _nano_conv_kernel(x_ref, wpre_ref, w2_ref, c_ref, out_ref):
    # Keep an f32 copy of the tile for the residual / LayerNorm path and a
    # bf16 copy for the MXU operands.
    x = x_ref[...].astype(jnp.float32)                                 # [TB, D]
    xb = x_ref[...].astype(jnp.bfloat16)

    b_pre = c_ref[0:1, :]                                              # [1, D] f32
    b2 = c_ref[1:2, :]
    gamma = c_ref[2:3, :]
    beta = c_ref[3:4, :]

    # Folded (attention @ seq_len==1) + first FF layer, then ReLU.
    h = jnp.dot(xb, wpre_ref[...], preferred_element_type=jnp.float32) + b_pre
    h = jnp.maximum(h, 0.0)                                            # f32 VPU
    t = jnp.dot(h.astype(jnp.bfloat16), w2_ref[...],
                preferred_element_type=jnp.float32) + b2
    # TODO(synk): nn.Dropout(0.1) is the identity in eval/inference mode; no
    # stochastic masking is applied here.

    # Residual + LayerNorm (centered form, f32 throughout).
    y = x + t
    mean = jnp.mean(y, axis=-1, keepdims=True)
    yc = y - mean
    var = jnp.mean(yc * yc, axis=-1, keepdims=True)
    inv = lax.rsqrt(var + _LN_EPS)                                     # EUP op
    out_ref[...] = ((yc * inv) * gamma + beta).astype(out_ref.dtype)   # [TB, D]


def nano_conv_forward(features, params, *, block_b: int = 1024):
    """Fused NanoConvLayer forward as a single batch-tiled Pallas call."""
    B, D = features.shape

    # ---- wrapper-side exact weight folding (f32), cast dot weights to bf16 --
    #   attn = x @ (Wv @ Wo) + (bv @ Wo + bo)
    #   h    = attn @ W1 + b1  ==  x @ W_pre + b_pre
    w_att = params["wv"] @ params["wo"]
    b_att = params["bv"] @ params["wo"] + params["bo"]
    w_pre = (w_att @ params["w1"]).astype(jnp.bfloat16)                # [D, D]
    b_pre = b_att @ params["w1"] + params["b1"]                        # [1, D] f32
    w2 = params["w2"].astype(jnp.bfloat16)                             # [D, D]
    consts = jnp.concatenate(
        [b_pre, params["b2"], params["gamma"], params["beta"]], axis=0
    ).astype(jnp.float32)                                              # [4, D]

    # ---- batch tile: sublane-aligned, large enough to amortize per-step
    # overhead, capped so big batches produce >= 4 grid steps (v7x 2 TCs). ----
    tb = max(8, min(block_b, _round_up(pl.cdiv(B, 4), 8)))
    grid = (pl.cdiv(B, tb),)

    row_spec = pl.BlockSpec((tb, D), lambda i: (i, 0))
    w_spec = pl.BlockSpec((D, D), lambda i: (0, 0))      # weights stay resident
    c_spec = pl.BlockSpec((4, D), lambda i: (0, 0))      # packed bias/LN consts

    grid_spec = pltpu.PrefetchScalarGridSpec(
        num_scalar_prefetch=0,
        grid=grid,
        in_specs=[row_spec, w_spec, w_spec, c_spec],
        out_specs=row_spec,
    )

    itemsize = features.dtype.itemsize
    cost = pl.CostEstimate(
        flops=4 * B * D * D,                 # two [B,D]x[D,D] matmuls
        transcendentals=B,                   # one rsqrt per row
        bytes_accessed=2 * B * D * itemsize + 2 * D * D * 2 + 4 * D * 4,
    )

    return pl.pallas_call(
        _nano_conv_kernel,
        out_shape=jax.ShapeDtypeStruct((B, D), features.dtype),
        grid_spec=grid_spec,
        compiler_params=pltpu.CompilerParams(
            dimension_semantics=("parallel",),     # megacore / 2-TC sharding
        ),
        cost_estimate=cost,
    )(features, w_pre, w2, consts)


def init_params(key, feature_dim: int):
    """Deterministic parameter init; shapes follow the PyTorch module."""
    ks = jax.random.split(key, 12)
    s = 0.05

    def w(k):  # stored as [in, out] (transpose of nn.Linear.weight)
        return s * jax.random.normal(k, (feature_dim, feature_dim), jnp.float32)

    def b(k):
        return s * jax.random.normal(k, (1, feature_dim), jnp.float32)

    return {
        # MultiheadAttention in_proj (q/k only used by the reference check:
        # they are mathematically inert at seq_len == 1) + out_proj.
        "wq": w(ks[0]), "bq": b(ks[1]),
        "wk": w(ks[2]), "bk": b(ks[3]),
        "wv": w(ks[4]), "bv": b(ks[5]),
        "wo": w(ks[6]), "bo": b(ks[7]),
        # feature_transform
        "w1": w(ks[8]), "b1": b(ks[9]),
        "w2": w(ks[10]), "b2": b(ks[11]),
        # LayerNorm
        "gamma": jnp.ones((1, feature_dim), jnp.float32),
        "beta": jnp.zeros((1, feature_dim), jnp.float32),
    }


def _reference(x, p, num_heads: int = 4):
    """Pure-JAX f32 reference with the FULL multi-head attention path (seq=1)."""
    B, D = x.shape
    dh = D // num_heads
    q = (x @ p["wq"] + p["bq"]).reshape(B, num_heads, dh)
    k = (x @ p["wk"] + p["bk"]).reshape(B, num_heads, dh)
    v = (x @ p["wv"] + p["bv"]).reshape(B, num_heads, dh)
    scores = jnp.sum(q * k, axis=-1, keepdims=True) / jnp.sqrt(dh)   # [B, H, 1]
    w = jax.nn.softmax(scores, axis=-1)                              # == 1.0
    attn = (w * v).reshape(B, D) @ p["wo"] + p["bo"]
    h = jnp.maximum(attn @ p["w1"] + p["b1"], 0.0)
    t = h @ p["w2"] + p["b2"]                       # Dropout: identity (eval)
    y = x + t
    mean = y.mean(-1, keepdims=True)
    var = ((y - mean) ** 2).mean(-1, keepdims=True)
    return (y - mean) / jnp.sqrt(var + _LN_EPS) * p["gamma"] + p["beta"]


if __name__ == "__main__":
    feature_dim = 128   # divisible by num_heads=4, lane-dense (=128)
    batch = 20          # NOT divisible by the batch tile -> exercises the
                        # ragged last block (padded reads, masked writes).

    key = jax.random.PRNGKey(0)
    k_x, k_p = jax.random.split(key)
    features = jax.random.normal(k_x, (batch, feature_dim), jnp.float32)
    params = init_params(k_p, feature_dim)

    run = jax.jit(functools.partial(nano_conv_forward, block_b=1024))
    out = run(features, params)
    jax.block_until_ready(out)

    ref = _reference(features, params)
    assert out.shape == (batch, feature_dim)
    # bf16 MXU operands (f32 accumulation) -> ~1e-3 level deviation vs the
    # f32 reference; 1e-2 tolerance is comfortably above it.
    err = float(jnp.max(jnp.abs(out - ref)))
    assert jnp.allclose(out, ref, atol=1e-2, rtol=1e-2), err

    print("KERNEL_OK")
</pallas_src>

<mosaic_0001>
module attributes {stable_mosaic.version = 11 : i64} {
  func.func @_nano_conv_kernel(%arg0: i32, %arg1: memref<8x128xf32, #tpu.memory_space<vmem>>, %arg2: memref<128x128xbf16, #tpu.memory_space<vmem>>, %arg3: memref<128x128xbf16, #tpu.memory_space<vmem>>, %arg4: memref<4x128xf32, #tpu.memory_space<vmem>>, %arg5: memref<8x128xf32, #tpu.memory_space<vmem>>) attributes {dimension_semantics = [#tpu.dimension_semantics<parallel>], iteration_bounds = array<i64: 3>, scalar_prefetch = 0 : i64, scratch_operands = 0 : i64, tpu.core_type = #tpu.core_type<tc>, window_params = [{transform_indices = @transform_0, window_bounds = array<i64: 8, 128>}, {pipeline_mode = #tpu.pipeline_mode<synchronous>, transform_indices = @transform_1, window_bounds = array<i64: 128, 128>}, {pipeline_mode = #tpu.pipeline_mode<synchronous>, transform_indices = @transform_2, window_bounds = array<i64: 128, 128>}, {pipeline_mode = #tpu.pipeline_mode<synchronous>, transform_indices = @transform_3, window_bounds = array<i64: 4, 128>}, {transform_indices = @transform_4, window_bounds = array<i64: 8, 128>}]} {
    %c0 = arith.constant 0 : index
    %c0_0 = arith.constant 0 : index
    %0 = vector.load %arg1[%c0, %c0_0] : memref<8x128xf32, #tpu.memory_space<vmem>>, vector<8x128xf32>
    %c0_1 = arith.constant 0 : index
    %c0_2 = arith.constant 0 : index
    %1 = vector.load %arg1[%c0_1, %c0_2] : memref<8x128xf32, #tpu.memory_space<vmem>>, vector<8x128xf32>
    %2 = arith.truncf %1 : vector<8x128xf32> to vector<8x128xbf16>
    %c0_3 = arith.constant 0 : index
    %c0_4 = arith.constant 0 : index
    %3 = vector.load %arg4[%c0_3, %c0_4] : memref<4x128xf32, #tpu.memory_space<vmem>>, vector<1x128xf32>
    %c1 = arith.constant 1 : index
    %c0_5 = arith.constant 0 : index
    %4 = vector.load %arg4[%c1, %c0_5] : memref<4x128xf32, #tpu.memory_space<vmem>>, vector<1x128xf32>
    %c2 = arith.constant 2 : index
    %c0_6 = arith.constant 0 : index
    %5 = vector.load %arg4[%c2, %c0_6] : memref<4x128xf32, #tpu.memory_space<vmem>>, vector<1x128xf32>
    %c3 = arith.constant 3 : index
    %c0_7 = arith.constant 0 : index
    %6 = vector.load %arg4[%c3, %c0_7] : memref<4x128xf32, #tpu.memory_space<vmem>>, vector<1x128xf32>
    %c0_8 = arith.constant 0 : index
    %c0_9 = arith.constant 0 : index
    %7 = vector.load %arg2[%c0_8, %c0_9] : memref<128x128xbf16, #tpu.memory_space<vmem>>, vector<128x128xbf16>
    %cst = arith.constant dense<0.000000e+00> : vector<8x128xf32>
    %8 = tpu.matmul %2, %7, %cst {dimension_numbers = #tpu.dot_dimension_numbers<[1], [0], [0], [1], [0, 0, 1, 1], [], []>} : vector<8x128xbf16>, vector<128x128xbf16>, vector<8x128xf32> -> vector<8x128xf32>
    %9 = vector.broadcast %3 : vector<1x128xf32> to vector<8x128xf32>
    %10 = arith.addf %8, %9 : vector<8x128xf32>
    %cst_10 = arith.constant 0.000000e+00 : f32
    %11 = vector.broadcast %cst_10 : f32 to vector<8x128xf32>
    %12 = arith.maximumf %10, %11 : vector<8x128xf32>
    %13 = arith.truncf %12 : vector<8x128xf32> to vector<8x128xbf16>
    %c0_11 = arith.constant 0 : index
    %c0_12 = arith.constant 0 : index
    %14 = vector.load %arg3[%c0_11, %c0_12] : memref<128x128xbf16, #tpu.memory_space<vmem>>, vector<128x128xbf16>
    %cst_13 = arith.constant dense<0.000000e+00> : vector<8x128xf32>
    %15 = tpu.matmul %13, %14, %cst_13 {dimension_numbers = #tpu.dot_dimension_numbers<[1], [0], [0], [1], [0, 0, 1, 1], [], []>} : vector<8x128xbf16>, vector<128x128xbf16>, vector<8x128xf32> -> vector<8x128xf32>
    %16 = vector.broadcast %4 : vector<1x128xf32> to vector<8x128xf32>
    %17 = arith.addf %15, %16 : vector<8x128xf32>
    %18 = arith.addf %0, %17 : vector<8x128xf32>
    %cst_14 = arith.constant dense<0.000000e+00> : vector<8xf32>
    %19 = vector.multi_reduction <add>, %18, %cst_14 [1] : vector<8x128xf32> to vector<8xf32>
    %20 = vector.shape_cast %19 : vector<8xf32> to vector<8x1xf32>
    %cst_15 = arith.constant 1.280000e+02 : f32
    %21 = vector.broadcast %cst_15 : f32 to vector<8x1xf32>
    %22 = arith.divf %20, %21 : vector<8x1xf32>
    %23 = vector.broadcast %22 : vector<8x1xf32> to vector<8x128xf32>
    %24 = arith.subf %18, %23 : vector<8x128xf32>
    %25 = arith.mulf %24, %24 : vector<8x128xf32>
    %cst_16 = arith.constant dense<0.000000e+00> : vector<8xf32>
    %26 = vector.multi_reduction <add>, %25, %cst_16 [1] : vector<8x128xf32> to vector<8xf32>
    %27 = vector.shape_cast %26 : vector<8xf32> to vector<8x1xf32>
    %cst_17 = arith.constant 1.280000e+02 : f32
    %28 = vector.broadcast %cst_17 : f32 to vector<8x1xf32>
    %29 = arith.divf %27, %28 : vector<8x1xf32>
    %cst_18 = arith.constant 9.99999974E-6 : f32
    %30 = vector.broadcast %cst_18 : f32 to vector<8x1xf32>
    %31 = arith.addf %29, %30 : vector<8x1xf32>
    %32 = math.rsqrt %31 : vector<8x1xf32>
    %33 = vector.broadcast %32 : vector<8x1xf32> to vector<8x128xf32>
    %34 = arith.mulf %24, %33 : vector<8x128xf32>
    %35 = vector.broadcast %5 : vector<1x128xf32> to vector<8x128xf32>
    %36 = arith.mulf %34, %35 : vector<8x128xf32>
    %37 = vector.broadcast %6 : vector<1x128xf32> to vector<8x128xf32>
    %38 = arith.addf %36, %37 : vector<8x128xf32>
    %c0_19 = arith.constant 0 : index
    %c0_20 = arith.constant 0 : index
    %39 = vector.load %arg5[%c0_19, %c0_20] : memref<8x128xf32, #tpu.memory_space<vmem>>, vector<8x128xf32>
    tpu.vector_store %arg5[%c0_19, %c0_20], %38 {strides = array<i32>} : memref<8x128xf32, #tpu.memory_space<vmem>>, vector<8x128xf32>,
    return
  }
  func.func @transform_0(%arg0: i32) -> (i32, i32) {
    %c0_i32 = arith.constant 0 : i32
    %c0_i32_0 = arith.constant 0 : i32
    return %arg0, %c0_i32 : i32, i32
  }
  func.func @transform_1(%arg0: i32) -> (i32, i32) {
    %c0_i32 = arith.constant 0 : i32
    %c0_i32_0 = arith.constant 0 : i32
    %c0_i32_1 = arith.constant 0 : i32
    return %c0_i32, %c0_i32_0 : i32, i32
  }
  func.func @transform_2(%arg0: i32) -> (i32, i32) {
    %c0_i32 = arith.constant 0 : i32
    %c0_i32_0 = arith.constant 0 : i32
    %c0_i32_1 = arith.constant 0 : i32
    return %c0_i32, %c0_i32_0 : i32, i32
  }
  func.func @transform_3(%arg0: i32) -> (i32, i32) {
    %c0_i32 = arith.constant 0 : i32
    %c0_i32_0 = arith.constant 0 : i32
    %c0_i32_1 = arith.constant 0 : i32
    return %c0_i32, %c0_i32_0 : i32, i32
  }
  func.func @transform_4(%arg0: i32) -> (i32, i32) {
    %c0_i32 = arith.constant 0 : i32
    %c0_i32_0 = arith.constant 0 : i32
    return %arg0, %c0_i32 : i32, i32
  }
}

</mosaic_0001>

<bundles_post_ra>
// kernel: nano_conv_forward.1
= control target key start
LH: loop header
LB: loop body
LE: loop exit
PB: predicated region body
PF: predicated region fallthrough
CT: control target
= control target key end

     0   :  { %9 = vsyncpa [#allocation3], 0  ;;  %s899_s0 = inlined_call_operand.vmem [shape: f32[20,128], index: 0, kind: input, shape index: {}]   ;;  %s900_s1 = inlined_call_operand.vmem [shape: bf16[128,128], index: 1, kind: input, shape index: {}]   ;;  %s901_s2 = inlined_call_operand.vmem [shape: bf16[128,128], index: 2, kind: input, shape index: {}]   ;;  %s902_s3 = inlined_call_operand.vmem [shape: f32[4,128], index: 3, kind: input, shape index: {}]   ;;  %s903_s4 = inlined_call_operand.hbm [shape: f32[20,128], index: 4, kind: output, shape index: {}]  }
   0x1   :  { %11 = vsyncpa [#allocation3 + $0x1], 0  ;;  %s752_s15 = smov 0   ;;  %s754_s16 = smov 0  }
   0x2   :  { %s756_s17 = smov 0   ;;  %s758_s18 = smov 0  }
   0x3 LB: > { %s773_s19 = sadd.s32 4294967295, %s722_s18   ;;  %s515_s20 = sadd.s32 4294967294, %s722_s18   ;;  %s722_s18 = sphi %s758_s18, %s909_s18   ;;  %s718_s17 = sphi %s756_s17, %s908_s17   ;;  %s714_s16 = sphi %s754_s16, %s907_s16   ;;  %s710_s15 = sphi %s752_s15, %s906_s15  }
   0x4   : > { %s777_s21 = sadd.s32 1, %s722_s18   ;;  %s113_s22 = sadd.s32 1, %s718_s17 }
   0x5   : > { %s110_s23 = ssub.s32 %s722_s18, %s777_s21  ;;  %p123_p0 = scmp.ne.s32.totalorder %s718_s17, %s714_s16 }
   0x6   : > { %p111_p1 = scmp.eq.s32.totalorder %s110_s23, 0  ;;  %p124_p2 = scmp.eq.s32.totalorder %s773_s19, 2 }
   0x7   : > { %p129_p3 = scmp.ne.s32.totalorder %s714_s16, %s710_s15  ;;  %p130_p4 = scmp.eq.s32.totalorder %s515_s20, 2 }
   0x8   : > { %s788_s24 = scalar_select %p111_p1, %s718_s17, %s113_s22  }
   0x9   : > { %p790_p5 = por %p124_p2, %p123_p0  ;;  %p794_p6 = por %p130_p4, %p129_p3 }
   0xa   : > { %p518_p7 = scmp.ge.s32.totalorder %s722_s18, 1  ;;  %p164_p8 = scmp.lt.s32.totalorder %s722_s18, 4 }
   0xc   : > { %p165_p9 = pnand %p518_p7, %p164_p8 }
   0xd   : > { %p189_p10 = scmp.lt.s32.totalorder (!%p165_p9), %s773_s19, 2  ;;  %s186_s8 = sand.u32 (!%p165_p9), 1, %s714_s16  }
   0xe   : > { %168 = sbr.rel (%p165_p9) target bundleno = 767 (0x2ff), region = 36  ;;  %s519_s9 = sshll.u32 (!%p165_p9), %s186_s8, 3 }
   0xf   : > { %s542_s14 = sshll.u32 (!%p165_p9), %s773_s19, 7  ;;  %s188_s20 = scalar_lea.vmem (!%p165_p9), [#allocation2], %s519_s9 }
  0x10   : > { %s456_s22 = sshll.u32 (!%p165_p9), %s188_s20, 4  ;;  %s454_s28 = scalar_lea.hbm (!%p165_p9), %s903_s4, %s542_s14  ;;  %s457_s22 = int_to_ptr.vmem [resolvable:$true] %s456_s22 }
  0x11   : > { %s443_s29 = scalar_lea.sflag (!%p165_p9), [#allocation3], %s186_s8  ;;  %s662_s30 = scalar_lea.vmem (!%p165_p9), %s457_s22, 128 }
  0x12   : > { %p663_p11 = scmp.ne.s32.totalorder (!%p165_p9), %s457_s22, %s662_s30 }
  0x13   : > { %v644_v0 = vld [vmem:[%s900_s1 + $0x38] sm:$0xff]   ;;  %v724_v1 = vmov 0.0   ;;  %v645_v2 = vld [vmem:[%s900_s1 + $0x30] sm:$0xff]   ;;  %vm725_vm0 = vmmov 0   ;;  %v646_v3 = vld [vmem:[%s900_s1 + $0x28] sm:$0xff]   ;;  %s190_s23 = scalar_select %p189_p10, %s773_s19, 2 }
  0x14   : > { %563 = vmatprep.subr.bf16.mxu0 %v724_v1  ;;  %583 = vmatprep.subr.bf16.mxu1 %v724_v1  ;;  %v652_v4 = vld [vmem:[%s901_s2 + $0x38] sm:$0xff]   ;;  %v647_v5 = vld [vmem:[%s900_s1 + $0x20] sm:$0xff]   ;;  %v653_v6 = vld [vmem:[%s901_s2 + $0x30] sm:$0xff]   ;;  %p664_p12 = pnand %p663_p11, %p790_p5 }
  0x15   : > { %564 = vmatpush3.bf16.msra.mxu0 %v644_v0  ;;  %579 = vmatprep.mubr.msk.bf16.mxu0 %vm725_vm0, %v724_v1  ;;  %v648_v7 = vld [vmem:[%s900_s1 + $0x18] sm:$0xff]   ;;  %v654_v8 = vld [vmem:[%s901_s2 + $0x28] sm:$0xff]   ;;  %v649_v9 = vld [vmem:[%s900_s1 + $0x10] sm:$0xff]   ;;  %s520_s5 = sshll.u32 %s190_s23, 3 }
  0x16   : > { %565 = vmatprep.subr.bf16.mxu0 %v724_v1  ;;  %599 = vmatprep.mubr.msk.bf16.mxu1 %vm725_vm0, %v724_v1  ;;  %v655_v10 = vld [vmem:[%s901_s2 + $0x20] sm:$0xff]   ;;  %v650_v11 = vld [vmem:[%s900_s1 + $0x8] sm:$0xff]   ;;  %s192_s10 = scalar_lea.vmem %s899_s0, %s520_s5  ;;  %v656_v12 = vld [vmem:[%s901_s2 + $0x18] sm:$0xff]   ;;  %p665_p13 = pneg %p664_p12 }
  0x17   : > { %584 = vmatpush3.bf16.msra.mxu1 %v652_v4  ;;  %v651_v13 = vld [vmem:[%s900_s1] sm:$0xff]   ;;  %v657_v15 = vld [vmem:[%s901_s2 + $0x10] sm:$0xff]   ;;  %v658_v17 = vld [vmem:[%s901_s2 + $0x8] sm:$0xff]   ;;  %s726_s5 = smov [#allocation2]  }
  0x18   : > { %585 = vmatprep.subr.bf16.mxu1 %v724_v1  ;;  %v194_v14 = vld [vmem:[%s192_s10] sm:$0xff]  ;;  %s666_s6 = sshll.u32 %s726_s5, 4  ;;  %s667_s6 = int_to_ptr.vmem [resolvable:$false] %s666_s6 }
  0x19   : > { %566 = vmatpush3.bf16.msra.mxu0 %v645_v2  ;;  %v195_v16 = vpack.c.bf16 %v194_v14, %v194_v14  ;;  %v659_v18 = vld [vmem:[%s901_s2] sm:$0xff]   ;;  %s668_s19 = scalar_lea.vmem %s667_s6, 256  ;;  %p669_p0 = scmp.lt.s32.totalorder %s457_s22, %s667_s6 }
  0x1a   : > { %567 = vmatprep.subr.bf16.mxu0 %v724_v1  ;;  %v521_v19 = vld [vmem:[%s902_s3] ss:$0 sm:$0xff]  ;;  %v530_v27 = vld [vmem:[%s902_s3 + $0x1] ss:$0 sm:$0xff]  ;;  %v539_v42 = vld [vmem:[%s902_s3 + $0x2] ss:$0 sm:$0xff]  ;;  %p670_p1 = scmp.lt.s32.totalorder %s668_s19, %s662_s30 }
  0x1b   : > { %586 = vmatpush3.bf16.msra.mxu1 %v653_v6  ;;  %v540_v44 = vld [vmem:[%s902_s3 + $0x3] ss:$0 sm:$0xff] }
  0x1c   : > { %587 = vmatprep.subr.bf16.mxu1 %v724_v1  ;;  %p671_p2 = por %p670_p1, %p669_p0 }
  0x1d   : > { %568 = vmatpush3.bf16.msra.mxu0 %v646_v3 }
  0x1e   : > { %569 = vmatprep.subr.bf16.mxu0 %v724_v1  ;;  %p672_p3 = pnand %p671_p2, %p665_p13 }
  0x1f   : > { %588 = vmatpush3.bf16.msra.mxu1 %v654_v8 }
  0x20   : > { %589 = vmatprep.subr.bf16.mxu1 %v724_v1 }
  0x21   : > { %570 = vmatpush3.bf16.msra.mxu0 %v647_v5 }
  0x22   : > { %571 = vmatprep.subr.bf16.mxu0 %v724_v1 }
  0x23   : > { %590 = vmatpush3.bf16.msra.mxu1 %v655_v10 }
  0x24   : > { %591 = vmatprep.subr.bf16.mxu1 %v724_v1 }
  0x25   : > { %572 = vmatpush3.bf16.msra.mxu0 %v648_v7 }
  0x26   : > { %573 = vmatprep.subr.bf16.mxu0 %v724_v1 }
  0x27   : > { %592 = vmatpush3.bf16.msra.mxu1 %v656_v12 }
  0x28   : > { %593 = vmatprep.subr.bf16.mxu1 %v724_v1 }
  0x29   : > { %574 = vmatpush3.bf16.msra.mxu0 %v649_v9 }
  0x2a   : > { %575 = vmatprep.subr.bf16.mxu0 %v724_v1 }
  0x2b   : > { %594 = vmatpush3.bf16.msra.mxu1 %v657_v15 }
  0x2c   : > { %595 = vmatprep.subr.bf16.mxu1 %v724_v1 }
  0x2d   : > { %576 = vmatpush3.bf16.msra.mxu0 %v650_v11 }
  0x2e   : > { %577 = vmatprep.subr.bf16.mxu0 %v724_v1 }
  0x2f   : > { %596 = vmatpush3.bf16.msra.mxu1 %v658_v17 }
  0x30   : > { %597 = vmatprep.subr.bf16.mxu1 %v724_v1 }
  0x31   : > { %578 = vmatpush3.bf16.msra.mxu0 %v651_v13 }
  0x33   : > { %598 = vmatpush3.bf16.msra.mxu1 %v659_v18 }
  0x34   : > { %580 = vmatmul.mubr.bf16.vlgmr.msra.gmra.mxu0 %v195_v16 }
  0xf4   : > { %v302_v20 = vpop.f32.mrf.mxu0 }
  0xf5   : > { %v303_v21 = vadd.f32 %v521_v19, %v302_v20 }
  0xf6   : > { %v581_v22 = vpop.f32.mrf.mxu0 }
  0xf7   : > { %v308_v23 = vmax.f32 %v303_v21, 0.0 }
  0xf8   : > { %v305_v24 = vpop.f32.mrf.mxu0 }
  0xf9   : > { %v309_v25 = vpack.c.bf16 %v308_v23, %v308_v23 }
  0xfa   : > { %v582_v26 = vpop.f32.mrf.mxu0 }
  0xfb   : > { %600 = vmatmul.mubr.bf16.vlgmr.msra.gmra.mxu1 %v309_v25 }
 0x1bb   : > { %v412_v28 = vpop.f32.mrf.mxu1 }
 0x1bc   : > { %v413_v29 = vadd.f32 %v530_v27, %v412_v28 }
 0x1bd   : > { %v601_v30 = vpop.f32.mrf.mxu1 }
 0x1be   : > { %v418_v31 = vadd.f32 %v413_v29, %v194_v14 }
 0x1bf   : > { %v415_v32 = vpop.f32.mrf.mxu1 }
 0x1c0   : > { %419 = vadd.xlane.f32.xlu0 %v418_v31 }
 0x1c1   : > { %v602_v33 = vpop.f32.mrf.mxu1 }
 0x249   : > { %v420_v34 = vpop.xlane.xlu0 %419 }
 0x24a   : > { %v422_v35 = vmul.f32 0.0078125, %v420_v34 }
 0x24c   : > { %v423_v36 = vsub.f32 %v418_v31, %v422_v35 }
 0x24e   : > { %v424_v37 = vmul.f32 %v423_v36, %v423_v36 }
 0x250   : > { %425 = vadd.xlane.f32.xlu0 %v424_v37 }
 0x2d9   : > { %v426_v38 = vpop.xlane.xlu0 %425 }
 0x2da   : > { %v427_v39 = vmul.f32 0.0078125, %v426_v38 }
 0x2dc   : > { %v428_v40 = vadd.f32 1e-05, %v427_v39 }
 0x2de   : > { %660 = vrsqrt.f32 %v428_v40 }
 0x2eb   : > { %v661_v41 = vpop.eup %660 }
 0x2ec   : > { %v430_v43 = vmul.f32 %v661_v41, %v423_v36 }
 0x2ee   : > { %v435_v45 = vmul.f32 %v539_v42, %v430_v43 }
 0x2f0   : > { %v440_v46 = vadd.f32 %v540_v44, %v435_v45 }
 0x2f2   : > { %441 = vst [vmem:[%s188_s20] sm:$0xff] %v440_v46 }
 0x2f3   : > { %675 = shalt.err (!%p672_p3)
}
 0x2f4   : > { %s676_s7 = scalar_lea.hbm %s454_s28, 128  ;;  %s680_s10 = scalar_lea.hbm %s903_s4, 384 }
 0x2f5   : > { %p677_p4 = scmp.ne.s32.totalorder %s454_s28, %s676_s7  ;;  %p681_p9 = scmp.lt.s32.totalorder %s454_s28, %s903_s4 }
 0x2f6   : > { %p682_p10 = scmp.lt.s32.totalorder %s680_s10, %s676_s7 }
 0x2f7   : > { %p678_p7 = pnand %p677_p4, %p790_p5 }
 0x2f8   : > { %p683_p11 = por %p682_p10, %p681_p9 }
 0x2f9   : > { %p679_p8 = pneg %p678_p7 }
 0x2fb   : > { %p684_p12 = pnand %p683_p11, %p679_p8 }
 0x2fd   : > { %687 = shalt.err (!%p684_p12)
}
 0x2fe   : > { %603 = dma.vmem_to_hbm [thread:$0]  (%p790_p5), %s457_s22, 128, %s454_s28, %s443_s29  }
 0x2ff PF: > { %p609_p13 = scmp.ge.s32.totalorder %s722_s18, 2  ;;  %s468_s13 = sand.u32 1, %s710_s15  }
 0x300   : > { %s469_s14 = scalar_lea.sflag [#allocation3], %s468_s13 }
 0x301   : > { %p606_p0 = pnand %p609_p13, %p794_p6 }
 0x303   : > { %p607_p1 = pneg %p606_p0 }
 0x305   : > { %705 = dma.done.wait (%p607_p1), %s469_s14, 128  }
 0x306   : > { %707 = vsyncadd (%p607_p1), %s469_s14, 4294967168  ;;  %p14_p2 = scmp.ge.s32.totalorder %s777_s21, 5   ;;  %s906_s15 = smov %s714_s16 }
 0x307   : > { %s907_s16 = smov %s718_s17  ;;  %s908_s17 = smov %s788_s24 }
 0x308   : > { %s909_s18 = smov %s777_s21  ;;  %16 = sbr.rel (!%p14_p2) target bundleno = 3 (0x3), region = 71 }
 0x30d   :  { %474 = vsyncpa [#allocation3], 1 }
 0x30e   :  { %476 = vsyncpa [#allocation3 + $0x1], 1 }

</bundles_post_ra>
